<compile_context>
chip_gen: v7x
topology: tpu7x:2x2x1
jax: 0.10.0
libtpu: 0.0.40
codegen_flags: <defaults>
</compile_context>

<pallas_src>
import math

import jax
import jax.numpy as jnp
from jax.experimental import pallas as pl
from jax.experimental.pallas import tpu as pltpu

STATE_SIZE = 8
ACTION_SIZE = 6
HIDDEN_SIZE = 64
OUT_PAD = 8          # action dim padded to a full sublane group for aligned stores


def _dqn_kernel(xt_ref, w1_ref, b1_ref, w2_ref, b2_ref, w3_ref, b3_ref, out_ref):
    # xt: (STATE_SIZE, TB) compute dtype; weights (out, in); biases (out, 1) f32.
    xt = xt_ref[...]
    h1 = jnp.dot(w1_ref[...], xt, preferred_element_type=jnp.float32) + b1_ref[...]
    h1 = jnp.maximum(h1, 0.0)                                    # (64, TB) f32
    h2 = jnp.dot(w2_ref[...], h1.astype(w2_ref.dtype),
                 preferred_element_type=jnp.float32) + b2_ref[...]
    h2 = jnp.maximum(h2, 0.0)                                    # (64, TB) f32
    q = jnp.dot(w3_ref[...], h2.astype(w3_ref.dtype),
                preferred_element_type=jnp.float32) + b3_ref[...]
    out_ref[...] = q.astype(out_ref.dtype)                       # (8, TB) lane-dense


def dqn_forward(x, params, *, batch_tile=512, compute_dtype=jnp.bfloat16):
    """x: (B, STATE_SIZE) float32 -> (B, ACTION_SIZE) float32 Q-values.

    params are in PyTorch nn.Linear layout: w (out_features, in_features),
    b (out_features,).
    """
    w1, b1, w2, b2, w3, b3 = params
    B = x.shape[0]
    assert batch_tile % 128 == 0, "batch_tile must be a multiple of 128 lanes"

    # Lane-align the batch and tile it; pad a ragged tail with zeros.
    b_aligned = pl.cdiv(B, 128) * 128
    tb = min(batch_tile, b_aligned)
    b_padded = pl.cdiv(b_aligned, tb) * tb
    n_tiles = b_padded // tb

    # Wrapper-side layout plumbing: pad, transpose batch onto lanes, cast.
    xt = jnp.pad(x, ((0, b_padded - B), (0, 0))).T.astype(compute_dtype)  # (8, Bp)

    w1c = w1.astype(compute_dtype)
    w2c = w2.astype(compute_dtype)
    # Pad the final layer 6 -> 8 output rows (zeros) for a full (8,128) store tile.
    w3c = jnp.pad(w3, ((0, OUT_PAD - ACTION_SIZE), (0, 0))).astype(compute_dtype)
    b1c = b1.reshape(HIDDEN_SIZE, 1).astype(jnp.float32)
    b2c = b2.reshape(HIDDEN_SIZE, 1).astype(jnp.float32)
    b3c = jnp.pad(b3, (0, OUT_PAD - ACTION_SIZE)).reshape(OUT_PAD, 1).astype(jnp.float32)

    def resident(shape):
        # Same block every grid step -> stays resident in VMEM (not re-fetched).
        return pl.BlockSpec(shape, lambda i: (0, 0))

    qt = pl.pallas_call(
        _dqn_kernel,
        out_shape=jax.ShapeDtypeStruct((OUT_PAD, b_padded), jnp.float32),
        grid=(n_tiles,),
        in_specs=[
            pl.BlockSpec((STATE_SIZE, tb), lambda i: (0, i)),    # streamed x^T tiles
            resident(w1c.shape), resident(b1c.shape),
            resident(w2c.shape), resident(b2c.shape),
            resident(w3c.shape), resident(b3c.shape),
        ],
        out_specs=pl.BlockSpec((OUT_PAD, tb), lambda i: (0, i)),
        compiler_params=pltpu.CompilerParams(
            dimension_semantics=("parallel",)),                  # 2 TCs on v7x
    )(xt, w1c, b1c, w2c, b2c, w3c, b3c)

    return qt[:ACTION_SIZE, :B].T                                # (B, ACTION_SIZE) f32


def init_dqn_params(key, state_size=STATE_SIZE, action_size=ACTION_SIZE,
                    hidden_size=HIDDEN_SIZE):
    """Deterministic init mirroring PyTorch nn.Linear default
    (U[-1/sqrt(fan_in), 1/sqrt(fan_in)]), stored in PyTorch layout:
    weight (out_features, in_features), bias (out_features,)."""
    dims = [(hidden_size, state_size), (hidden_size, hidden_size),
            (action_size, hidden_size)]
    params = []
    for (fan_out, fan_in) in dims:
        key, kw, kb = jax.random.split(key, 3)
        bound = 1.0 / math.sqrt(fan_in)
        w = jax.random.uniform(kw, (fan_out, fan_in), jnp.float32, -bound, bound)
        b = jax.random.uniform(kb, (fan_out,), jnp.float32, -bound, bound)
        params.extend([w, b])
    return tuple(params)


def _reference_forward(x, params, compute_dtype):
    """Pure-JAX reference following the same dtype path as the kernel."""
    w1, b1, w2, b2, w3, b3 = params
    cd = compute_dtype
    h = jnp.dot(x.astype(cd), w1.T.astype(cd),
                preferred_element_type=jnp.float32) + b1
    h = jnp.maximum(h, 0.0)
    h = jnp.dot(h.astype(cd), w2.T.astype(cd),
                preferred_element_type=jnp.float32) + b2
    h = jnp.maximum(h, 0.0)
    return jnp.dot(h.astype(cd), w3.T.astype(cd),
                   preferred_element_type=jnp.float32) + b3


if __name__ == "__main__":
    key = jax.random.PRNGKey(0)
    key, kx = jax.random.split(key)
    params = init_dqn_params(key)

    # Small PyTorch-shaped input: (batch=2, state_size=8).
    batch = 2
    x = jax.random.normal(kx, (batch, STATE_SIZE), dtype=jnp.float32)

    # Exact-semantics check in f32 (matches the original nn.Module math).
    q_f32 = dqn_forward(x, params, compute_dtype=jnp.float32)
    jax.block_until_ready(q_f32)
    ref_f32 = _reference_forward(x, params, jnp.float32)
    assert q_f32.shape == (batch, ACTION_SIZE)
    assert jnp.allclose(q_f32, ref_f32, atol=1e-5, rtol=1e-5)

    # Default bandwidth-optimized path (bf16 streaming, f32 accumulation).
    q_bf16 = dqn_forward(x, params)
    jax.block_until_ready(q_bf16)
    ref_bf16 = _reference_forward(x, params, jnp.bfloat16)
    assert jnp.allclose(q_bf16, ref_bf16, atol=2e-2, rtol=2e-2)

    # Exercise multiple grid steps and a ragged tail (B not multiple of tile).
    key, kx2 = jax.random.split(key)
    x_big = jax.random.normal(kx2, (300, STATE_SIZE), dtype=jnp.float32)
    q_big = dqn_forward(x_big, params, batch_tile=128)
    jax.block_until_ready(q_big)
    ref_big = _reference_forward(x_big, params, jnp.bfloat16)
    assert q_big.shape == (300, ACTION_SIZE)
    assert jnp.allclose(q_big, ref_big, atol=2e-2, rtol=2e-2)

    print("KERNEL_OK")
</pallas_src>

<mosaic_0001>
module attributes {stable_mosaic.version = 11 : i64} {
  func.func @_dqn_kernel(%arg0: i32, %arg1: memref<8x128xf32, #tpu.memory_space<vmem>>, %arg2: memref<64x8xf32, #tpu.memory_space<vmem>>, %arg3: memref<64x1xf32, #tpu.memory_space<vmem>>, %arg4: memref<64x64xf32, #tpu.memory_space<vmem>>, %arg5: memref<64x1xf32, #tpu.memory_space<vmem>>, %arg6: memref<8x64xf32, #tpu.memory_space<vmem>>, %arg7: memref<8x1xf32, #tpu.memory_space<vmem>>, %arg8: memref<8x128xf32, #tpu.memory_space<vmem>>) attributes {dimension_semantics = [#tpu.dimension_semantics<parallel>], iteration_bounds = array<i64: 1>, scalar_prefetch = 0 : i64, scratch_operands = 0 : i64, tpu.core_type = #tpu.core_type<tc>, window_params = [{transform_indices = @transform_0, window_bounds = array<i64: 8, 128>}, {pipeline_mode = #tpu.pipeline_mode<synchronous>, transform_indices = @transform_1, window_bounds = array<i64: 64, 8>}, {pipeline_mode = #tpu.pipeline_mode<synchronous>, transform_indices = @transform_2, window_bounds = array<i64: 64, 1>}, {pipeline_mode = #tpu.pipeline_mode<synchronous>, transform_indices = @transform_3, window_bounds = array<i64: 64, 64>}, {pipeline_mode = #tpu.pipeline_mode<synchronous>, transform_indices = @transform_4, window_bounds = array<i64: 64, 1>}, {pipeline_mode = #tpu.pipeline_mode<synchronous>, transform_indices = @transform_5, window_bounds = array<i64: 8, 64>}, {pipeline_mode = #tpu.pipeline_mode<synchronous>, transform_indices = @transform_6, window_bounds = array<i64: 8, 1>}, {transform_indices = @transform_7, window_bounds = array<i64: 8, 128>}]} {
    %c0 = arith.constant 0 : index
    %c0_0 = arith.constant 0 : index
    %0 = vector.load %arg1[%c0, %c0_0] : memref<8x128xf32, #tpu.memory_space<vmem>>, vector<8x128xf32>
    %c0_1 = arith.constant 0 : index
    %c0_2 = arith.constant 0 : index
    %1 = vector.load %arg2[%c0_1, %c0_2] : memref<64x8xf32, #tpu.memory_space<vmem>>, vector<64x8xf32>
    %cst = arith.constant dense<0.000000e+00> : vector<64x128xf32>
    %2 = tpu.matmul %1, %0, %cst {dimension_numbers = #tpu.dot_dimension_numbers<[1], [0], [0], [1], [0, 0, 1, 1], [], []>} : vector<64x8xf32>, vector<8x128xf32>, vector<64x128xf32> -> vector<64x128xf32>
    %c0_3 = arith.constant 0 : index
    %c0_4 = arith.constant 0 : index
    %3 = vector.load %arg3[%c0_3, %c0_4] : memref<64x1xf32, #tpu.memory_space<vmem>>, vector<64x1xf32>
    %4 = vector.broadcast %3 : vector<64x1xf32> to vector<64x128xf32>
    %5 = arith.addf %2, %4 : vector<64x128xf32>
    %cst_5 = arith.constant 0.000000e+00 : f32
    %6 = vector.broadcast %cst_5 : f32 to vector<64x128xf32>
    %7 = arith.maximumf %5, %6 : vector<64x128xf32>
    %c0_6 = arith.constant 0 : index
    %c0_7 = arith.constant 0 : index
    %8 = vector.load %arg4[%c0_6, %c0_7] : memref<64x64xf32, #tpu.memory_space<vmem>>, vector<64x64xf32>
    %cst_8 = arith.constant dense<0.000000e+00> : vector<64x128xf32>
    %9 = tpu.matmul %8, %7, %cst_8 {dimension_numbers = #tpu.dot_dimension_numbers<[1], [0], [0], [1], [0, 0, 1, 1], [], []>} : vector<64x64xf32>, vector<64x128xf32>, vector<64x128xf32> -> vector<64x128xf32>
    %c0_9 = arith.constant 0 : index
    %c0_10 = arith.constant 0 : index
    %10 = vector.load %arg5[%c0_9, %c0_10] : memref<64x1xf32, #tpu.memory_space<vmem>>, vector<64x1xf32>
    %11 = vector.broadcast %10 : vector<64x1xf32> to vector<64x128xf32>
    %12 = arith.addf %9, %11 : vector<64x128xf32>
    %cst_11 = arith.constant 0.000000e+00 : f32
    %13 = vector.broadcast %cst_11 : f32 to vector<64x128xf32>
    %14 = arith.maximumf %12, %13 : vector<64x128xf32>
    %c0_12 = arith.constant 0 : index
    %c0_13 = arith.constant 0 : index
    %15 = vector.load %arg6[%c0_12, %c0_13] : memref<8x64xf32, #tpu.memory_space<vmem>>, vector<8x64xf32>
    %cst_14 = arith.constant dense<0.000000e+00> : vector<8x128xf32>
    %16 = tpu.matmul %15, %14, %cst_14 {dimension_numbers = #tpu.dot_dimension_numbers<[1], [0], [0], [1], [0, 0, 1, 1], [], []>} : vector<8x64xf32>, vector<64x128xf32>, vector<8x128xf32> -> vector<8x128xf32>
    %c0_15 = arith.constant 0 : index
    %c0_16 = arith.constant 0 : index
    %17 = vector.load %arg7[%c0_15, %c0_16] : memref<8x1xf32, #tpu.memory_space<vmem>>, vector<8x1xf32>
    %18 = vector.broadcast %17 : vector<8x1xf32> to vector<8x128xf32>
    %19 = arith.addf %16, %18 : vector<8x128xf32>
    %c0_17 = arith.constant 0 : index
    %c0_18 = arith.constant 0 : index
    %20 = vector.load %arg8[%c0_17, %c0_18] : memref<8x128xf32, #tpu.memory_space<vmem>>, vector<8x128xf32>
    tpu.vector_store %arg8[%c0_17, %c0_18], %19 {strides = array<i32>} : memref<8x128xf32, #tpu.memory_space<vmem>>, vector<8x128xf32>,
    return
  }
  func.func @transform_0(%arg0: i32) -> (i32, i32) {
    %c0_i32 = arith.constant 0 : i32
    %c0_i32_0 = arith.constant 0 : i32
    return %c0_i32, %arg0 : i32, i32
  }
  func.func @transform_1(%arg0: i32) -> (i32, i32) {
    %c0_i32 = arith.constant 0 : i32
    %c0_i32_0 = arith.constant 0 : i32
    %c0_i32_1 = arith.constant 0 : i32
    return %c0_i32, %c0_i32_0 : i32, i32
  }
  func.func @transform_2(%arg0: i32) -> (i32, i32) {
    %c0_i32 = arith.constant 0 : i32
    %c0_i32_0 = arith.constant 0 : i32
    %c0_i32_1 = arith.constant 0 : i32
    return %c0_i32, %c0_i32_0 : i32, i32
  }
  func.func @transform_3(%arg0: i32) -> (i32, i32) {
    %c0_i32 = arith.constant 0 : i32
    %c0_i32_0 = arith.constant 0 : i32
    %c0_i32_1 = arith.constant 0 : i32
    return %c0_i32, %c0_i32_0 : i32, i32
  }
  func.func @transform_4(%arg0: i32) -> (i32, i32) {
    %c0_i32 = arith.constant 0 : i32
    %c0_i32_0 = arith.constant 0 : i32
    %c0_i32_1 = arith.constant 0 : i32
    return %c0_i32, %c0_i32_0 : i32, i32
  }
  func.func @transform_5(%arg0: i32) -> (i32, i32) {
    %c0_i32 = arith.constant 0 : i32
    %c0_i32_0 = arith.constant 0 : i32
    %c0_i32_1 = arith.constant 0 : i32
    return %c0_i32, %c0_i32_0 : i32, i32
  }
  func.func @transform_6(%arg0: i32) -> (i32, i32) {
    %c0_i32 = arith.constant 0 : i32
    %c0_i32_0 = arith.constant 0 : i32
    %c0_i32_1 = arith.constant 0 : i32
    return %c0_i32, %c0_i32_0 : i32, i32
  }
  func.func @transform_7(%arg0: i32) -> (i32, i32) {
    %c0_i32 = arith.constant 0 : i32
    %c0_i32_0 = arith.constant 0 : i32
    return %c0_i32, %arg0 : i32, i32
  }
}

</mosaic_0001>

<bundles_post_ra>
// kernel: tpu_custom_call.1
= control target key start
LH: loop header
LB: loop body
LE: loop exit
PB: predicated region body
PF: predicated region fallthrough
CT: control target
= control target key end

     0   :  { %vm84_vm0 = vcmask 64512   ;;  %v682_v4 = vmov 0   ;;  %s861_s0 = inlined_call_operand.vmem [shape: f32[8,128], index: 0, kind: input, shape index: {}]   ;;  %s862_s1 = inlined_call_operand.vmem [shape: f32[64,8], index: 1, kind: input, shape index: {}]   ;;  %s863_s2 = inlined_call_operand.vmem [shape: f32[64,1], index: 2, kind: input, shape index: {}]   ;;  %s864_s3 = inlined_call_operand.vmem [shape: f32[64,64], index: 3, kind: input, shape index: {}]   ;;  %s865_s4 = inlined_call_operand.vmem [shape: f32[64,1], index: 4, kind: input, shape index: {}]   ;;  %s866_s5 = inlined_call_operand.vmem [shape: f32[8,64], index: 5, kind: input, shape index: {}]   ;;  %s867_s6 = inlined_call_operand.vmem [shape: f32[8,1], index: 6, kind: input, shape index: {}]   ;;  %s868_s7 = inlined_call_operand.hbm [shape: f32[8,128], index: 7, kind: output, shape index: {}]  }
   0x1   :  { %v27_v0 = vld [vmem:[%s861_s0] sm:$0xff]  ;;  %v29_v2 = vld [vmem:[%s862_s1 + $0x8] sm:$0xff]  ;;  %v30_v3 = vld [vmem:[%s862_s1 + $0x10] sm:$0xff]  ;;  %656 = vset.pattern.permute.xlu0 %v682_v4  ;;  %657 = vset.pattern.permute.xlu1 %v682_v4 }
   0x2   :  { %v28_v1 = vld [vmem:[%s862_s1] sm:$0xff]  ;;  %562 = vmatprep.subr.mxu0 %v27_v0  ;;  %v38_v6 = vld [vmem:[%s863_s2 + $0x10] sm:$0xff]  ;;  %v31_v7 = vld [vmem:[%s862_s1 + $0x18] sm:$0xff] }
   0x3   :  { %564 = vmatprep.mubr.msk.f32.mxu0 %vm84_vm0, %v28_v1  ;;  %563 = vmatpush3.msra.mxu0 %v27_v0  ;;  %v36_v5 = vld [vmem:[%s863_s2] sm:$0xff]  ;;  %v37_v9 = vld [vmem:[%s863_s2 + $0x8] sm:$0xff]  ;;  %v39_v10 = vld [vmem:[%s863_s2 + $0x18] sm:$0xff] }
   0x4   :  { %565 = vmatmul.mubr.msk.f32.vlgmr.msra.gmra.mrb[0].mxu0 %vm84_vm0, %v29_v2  ;;  %46 = vperm.xlu0 %656, %v36_v5   ;;  %v32_v8 = vld [vmem:[%s862_s1 + $0x20] sm:$0xff]  ;;  %v33_v11 = vld [vmem:[%s862_s1 + $0x28] sm:$0xff] }
   0x5   :  { %567 = vmatprep.mubr.msk.f32.mxu0 %vm84_vm0, %v30_v3  ;;  %56 = vperm.xlu1 %657, %v38_v6  }
   0x8   :  { %568 = vmatmul.mubr.msk.f32.gmra.mrb[2].mxu0 %vm84_vm0, %v31_v7  ;;  %51 = vperm.xlu0 %656, %v37_v9  }
   0x9   :  { %570 = vmatprep.mubr.msk.f32.mxu0 %vm84_vm0, %v32_v8 }
   0xa   :  { %12 = vsyncpa [#allocation3], 0  ;;  %v34_v12 = vld [vmem:[%s862_s1 + $0x30] sm:$0xff]  ;;  %v40_v13 = vld [vmem:[%s863_s2 + $0x20] sm:$0xff]  ;;  %61 = vperm.xlu1 %657, %v39_v10   ;;  %vm278_vm1 = vcmask 523264   ;;  %v683_v7 = vmov 0.0|0.0  }
   0xb   :  { %v41_v14 = vld [vmem:[%s863_s2 + $0x28] sm:$0xff]  ;;  %v35_v15 = vld [vmem:[%s862_s1 + $0x38] sm:$0xff]  ;;  %v42_v16 = vld [vmem:[%s863_s2 + $0x30] sm:$0xff]  ;;  %639 = vmatprep.subr.bf16.mxu0 %v683_v7  ;;  %vm684_vm2 = vmmov 0   ;;  %v685_v8 = vmov 0.0  }
   0xc   :  { %571 = vmatmul.mubr.msk.f32.gmra.mrb[4].mxu0 %vm84_vm0, %v33_v11  ;;  %66 = vperm.xlu0 %656, %v40_v13   ;;  %v43_v17 = vld [vmem:[%s863_s2 + $0x38] sm:$0xff]  ;;  %v230_v18 = vld [vmem:[%s865_s4] sm:$0xff]  ;;  %v231_v19 = vld [vmem:[%s865_s4 + $0x8] sm:$0xff]  ;;  %s686_s2 = smov [#allocation2]  }
   0xd   :  { %573 = vmatprep.mubr.msk.f32.mxu0 %vm84_vm0, %v34_v12  ;;  %v232_v20 = vld [vmem:[%s865_s4 + $0x10] sm:$0xff]  ;;  %v233_v21 = vld [vmem:[%s865_s4 + $0x18] sm:$0xff]  ;;  %v234_v22 = vld [vmem:[%s865_s4 + $0x20] sm:$0xff]  ;;  %s503_s16 = sshll.u32 %s686_s2, 4  ;;  %s504_s16 = int_to_ptr.vmem [resolvable:$true] %s503_s16 }
   0xe   :  { %71 = vperm.xlu1 %657, %v41_v14   ;;  %v235_v23 = vld [vmem:[%s865_s4 + $0x28] sm:$0xff]  ;;  %v236_v24 = vld [vmem:[%s865_s4 + $0x30] sm:$0xff]  ;;  %v237_v25 = vld [vmem:[%s865_s4 + $0x38] sm:$0xff]  ;;  %s658_s17 = scalar_lea.vmem %s504_s16, 128  ;;  %p663_p1 = scmp.lt.s32.totalorder %s504_s16, %s504_s16 }
   0xf   :  { %v417_v26 = vld [vmem:[%s867_s6] sm:$0xff]  ;;  %v223_v0 = vld [vmem:[%s864_s3 + $0x8] sm:$0xff]  ;;  %v224_v1 = vld [vmem:[%s864_s3 + $0x10] sm:$0xff]  ;;  %p659_p0 = scmp.ne.s32.totalorder %s504_s16, %s658_s17  ;;  %p664_p2 = scmp.lt.s32.totalorder %s658_s17, %s658_s17 }
  0x10   :  { %574 = vmatmul.mubr.msk.f32.gmra.mrb[6].mxu0 %vm84_vm0, %v35_v15  ;;  %76 = vperm.xlu0 %656, %v42_v16   ;;  %v222_v27 = vld [vmem:[%s864_s3] sm:$0xff]  ;;  %v225_v2 = vld [vmem:[%s864_s3 + $0x18] sm:$0xff]  ;;  %v227_v4 = vld [vmem:[%s864_s3 + $0x28] sm:$0xff] }
  0x11   :  { %592 = vmatprep.mubr.msk.f32.mxu1 %vm278_vm1, %v222_v27  ;;  %v226_v3 = vld [vmem:[%s864_s3 + $0x20] sm:$0xff]  ;;  %v228_v5 = vld [vmem:[%s864_s3 + $0x30] sm:$0xff]  ;;  %v229_v6 = vld [vmem:[%s864_s3 + $0x38] sm:$0xff]  ;;  %620 = vmatprep.mubr.msk.f32.mxu0 %vm684_vm2, %v685_v8  ;;  %p665_p3 = por %p664_p2, %p663_p1 }
  0x12   :  { %81 = vperm.xlu1 %657, %v43_v17  }
  0x13   :  { %p666_p4 = pnand %p665_p3, %p659_p0 }
  0x14   :  { %240 = vperm.xlu0 %656, %v230_v18  }
  0x16   :  { %245 = vperm.xlu1 %657, %v231_v19  }
  0x18   :  { %250 = vperm.xlu0 %656, %v232_v20  }
  0x1a   :  { %255 = vperm.xlu1 %657, %v233_v21  }
  0x1c   :  { %260 = vperm.xlu0 %656, %v234_v22  }
  0x1e   :  { %265 = vperm.xlu1 %657, %v235_v23  }
  0x20   :  { %270 = vperm.xlu0 %656, %v236_v24  }
  0x22   :  { %275 = vperm.xlu1 %657, %v237_v25  }
  0x24   :  { %420 = vperm.xlu0 %656, %v417_v26  }
  0x83   :  { %v47_v28 = vpop.permute.xlu0 %46 }
  0x84   :  { %v57_v29 = vpop.permute.xlu1 %56 }
  0x87   :  { %v52_v30 = vpop.permute.xlu0 %51 }
  0x89   :  { %v62_v31 = vpop.permute.xlu1 %61 }
  0x8b   :  { %v67_v44 = vpop.permute.xlu0 %66 }
  0x8d   :  { %v72_v41 = vpop.permute.xlu1 %71 }
  0x8f   :  { %v77_v56 = vpop.permute.xlu0 %76 }
  0x91   :  { %v82_v53 = vpop.permute.xlu1 %81 }
  0x93   :  { %v241_v10 = vpop.permute.xlu0 %240 }
  0x95   :  { %v246_v9 = vpop.permute.xlu1 %245 }
  0x97   :  { %v251_v13 = vpop.permute.xlu0 %250 }
  0x99   :  { %v256_v11 = vpop.permute.xlu1 %255 }
  0x9b   :  { %v261_v25 = vpop.permute.xlu0 %260 }
  0x9d   :  { %v266_v22 = vpop.permute.xlu1 %265 }
  0xd7   :  { %v566_v32 = vpop.f32.mrb[0].mxu0 }
  0xd8   :  { %v181_v33 = vadd.f32 %v566_v32, %v52_v30  ;;  %v175_v34 = vpop.f32.mrb[1].mxu0 }
  0xd9   :  { %v176_v35 = vadd.f32 %v175_v34, %v47_v28  ;;  %v276_v34 = vpop.permute.xlu1 %275 }
  0xda   :  { %v215_v36 = vmax.f32 %v181_v33, 0.0 }
  0xdb   :  { %v214_v37 = vmax.f32 %v176_v35, 0.0  ;;  %v569_v38 = vpop.f32.mrb[2].mxu0 }
  0xdc   :  { %v191_v39 = vadd.f32 %v569_v38, %v62_v31  ;;  %v185_v40 = vpop.f32.mrb[3].mxu0 }
  0xdd   :  { %v186_v42 = vadd.f32 %v185_v40, %v57_v29  ;;  %v623_v43 = vpack.c.bf16 %v215_v36, %v214_v37  ;;  %v271_v37 = vpop.permute.xlu0 %270 }
  0xde   :  { %v217_v45 = vmax.f32 %v191_v39, 0.0 }
  0xdf   :  { %v216_v46 = vmax.f32 %v186_v42, 0.0  ;;  %v572_v47 = vpop.f32.mrb[4].mxu0  ;;  %624 = vmatprep.subr.bf16.mxu1 %v623_v43 }
  0xe0   :  { %v201_v48 = vadd.f32 %v572_v47, %v72_v41  ;;  %v195_v49 = vpop.f32.mrb[5].mxu0  ;;  %626 = vmatpush3.bf16.msra.mxu1 %v623_v43 }
  0xe1   :  { %v627_v50 = vpack.c.bf16 %v217_v45, %v216_v46  ;;  %v196_v51 = vadd.f32 %v195_v49, %v67_v44  ;;  %v416_v45 = vld [vmem:[%s866_s5] sm:$0xff]  ;;  %v421_v46 = vpop.permute.xlu0 %420 }
  0xe2   :  { %v219_v52 = vmax.f32 %v201_v48, 0.0 }
  0xe3   :  { %v218_v54 = vmax.f32 %v196_v51, 0.0  ;;  %v575_v55 = vpop.f32.mrb[6].mxu0  ;;  %628 = vmatprep.subr.bf16.mxu1 %v627_v50 }
  0xe4   :  { %v211_v57 = vadd.f32 %v575_v55, %v82_v53  ;;  %v205_v58 = vpop.f32.mrb[7].mxu0  ;;  %630 = vmatpush3.bf16.msra.mxu1 %v627_v50 }
  0xe5   :  { %v631_v59 = vpack.c.bf16 %v219_v52, %v218_v54  ;;  %v206_v60 = vadd.f32 %v205_v58, %v77_v56 }
  0xe6   :  { %v221_v61 = vmax.f32 %v211_v57, 0.0 }
  0xe7   :  { %v220_v62 = vmax.f32 %v206_v60, 0.0  ;;  %632 = vmatprep.subr.bf16.mxu1 %v631_v59 }
  0xe8   :  { %634 = vmatpush3.bf16.msra.mxu1 %v631_v59 }
  0xe9   :  { %v635_v63 = vpack.c.bf16 %v221_v61, %v220_v62 }
  0xeb   :  { %636 = vmatprep.subr.bf16.mxu1 %v635_v63 }
  0xec   :  { %638 = vmatpush3.bf16.msra.mxu1 %v635_v63 }
  0xef   :  { %593 = vmatmul.mubr.msk.f32.vlgmr.msra.gmra.mrb[0].mxu1 %vm278_vm1, %v223_v0 }
  0xf0   :  { %595 = vmatprep.mubr.msk.f32.mxu1 %vm278_vm1, %v224_v1 }
  0xf3   :  { %596 = vmatmul.mubr.msk.f32.gmra.mrb[2].mxu1 %vm278_vm1, %v225_v2 }
  0xf4   :  { %598 = vmatprep.mubr.msk.f32.mxu1 %vm278_vm1, %v226_v3 }
  0xf7   :  { %599 = vmatmul.mubr.msk.f32.gmra.mrb[4].mxu1 %vm278_vm1, %v227_v4 }
  0xf8   :  { %601 = vmatprep.mubr.msk.f32.mxu1 %vm278_vm1, %v228_v5 }
  0xfb   :  { %602 = vmatmul.mubr.msk.f32.gmra.mrb[6].mxu1 %vm278_vm1, %v229_v6 }
 0x1c2   :  { %v594_v12 = vpop.f32.mrb[0].mxu1 }
 0x1c3   :  { %v375_v14 = vadd.f32 %v594_v12, %v246_v9  ;;  %v369_v15 = vpop.f32.mrb[1].mxu1 }
 0x1c4   :  { %v370_v16 = vadd.f32 %v369_v15, %v241_v10 }
 0x1c5   :  { %v409_v17 = vmax.f32 %v375_v14, 0.0 }
 0x1c6   :  { %v408_v18 = vmax.f32 %v370_v16, 0.0  ;;  %v597_v19 = vpop.f32.mrb[2].mxu1 }
 0x1c7   :  { %v385_v20 = vadd.f32 %v597_v19, %v256_v11  ;;  %v379_v21 = vpop.f32.mrb[3].mxu1 }
 0x1c8   :  { %v640_v23 = vpack.c.bf16 %v409_v17, %v408_v18  ;;  %v380_v24 = vadd.f32 %v379_v21, %v251_v13 }
 0x1c9   :  { %v411_v26 = vmax.f32 %v385_v20, 0.0 }
 0x1ca   :  { %v410_v27 = vmax.f32 %v380_v24, 0.0  ;;  %v600_v28 = vpop.f32.mrb[4].mxu1  ;;  %641 = vmatpush3.bf16.msra.mxu0 %v640_v23 }
 0x1cb   :  { %v395_v29 = vadd.f32 %v600_v28, %v266_v22  ;;  %v389_v30 = vpop.f32.mrb[5].mxu1  ;;  %642 = vmatprep.subr.bf16.mxu0 %v683_v7 }
 0x1cc   :  { %v643_v31 = vpack.c.bf16 %v411_v26, %v410_v27  ;;  %v390_v32 = vadd.f32 %v389_v30, %v261_v25 }
 0x1cd   :  { %v413_v33 = vmax.f32 %v395_v29, 0.0 }
 0x1ce   :  { %v412_v35 = vmax.f32 %v390_v32, 0.0  ;;  %v603_v36 = vpop.f32.mrb[6].mxu1  ;;  %644 = vmatpush3.bf16.msra.mxu0 %v643_v31 }
 0x1cf   :  { %v405_v38 = vadd.f32 %v603_v36, %v276_v34  ;;  %v399_v39 = vpop.f32.mrb[7].mxu1  ;;  %645 = vmatprep.subr.bf16.mxu0 %v683_v7 }
 0x1d0   :  { %v646_v40 = vpack.c.bf16 %v413_v33, %v412_v35  ;;  %v400_v41 = vadd.f32 %v399_v39, %v271_v37 }
 0x1d1   :  { %v415_v42 = vmax.f32 %v405_v38, 0.0 }
 0x1d2   :  { %v414_v43 = vmax.f32 %v400_v41, 0.0  ;;  %647 = vmatpush3.bf16.msra.mxu0 %v646_v40 }
 0x1d3   :  { %648 = vmatprep.subr.bf16.mxu0 %v683_v7 }
 0x1d4   :  { %v649_v44 = vpack.c.bf16 %v415_v42, %v414_v43 }
 0x1d6   :  { %650 = vmatpush3.bf16.msra.mxu0 %v649_v44 }
 0x1d9   :  { %621 = vmatmul.mubr.msk.f32.vlgmr.msra.gmra.mrb[8].mxu0 %vm278_vm1, %v416_v45 }
 0x2ac   :  { %v492_v47 = vpop.f32.mrb[8].mxu0 }
 0x2ad   :  { %v493_v48 = vadd.f32 %v492_v47, %v421_v46  ;;  %v622_v49 = vpop.f32.mrb[9].mxu0 }
 0x2af   :  { %496 = vst [vmem:[#allocation2] sm:$0xff] %v493_v48 }
 0x2b0   :  { %669 = shalt.err (!%p666_p4)
}
 0x2b1   :  { %s670_s5 = scalar_lea.hbm %s868_s7, 128 }
 0x2b2   :  { %p671_p5 = scmp.ne.s32.totalorder %s868_s7, %s670_s5  ;;  %p674_p6 = scmp.lt.u32.totalorder %s670_s5, %s868_s7 }
 0x2b4   :  { %p676_p7 = pnand %p674_p6, %p671_p5 }
 0x2b6   :  { %679 = shalt.err (!%p676_p7)
}
 0x2b7   :  { %506 = dma.vmem_to_hbm [thread:$0]  %s504_s16, 128, %s868_s7, [#allocation3]  }
 0x2b8   :  { %680 = dma.done.wait [#allocation3], 128  }
 0x2b9   :  { %681 = vsyncadd [#allocation3], 4294967168 }
 0x2ba   :  { %510 = vsyncpa [#allocation3], 1 }

</bundles_post_ra>
